<compile_context>
chip_gen: v5e
topology: v5e:2x2
jax: 0.10.0
libtpu: 0.0.40
codegen_flags: <defaults>
</compile_context>

<pallas_src>
import functools

import jax
import jax.numpy as jnp
from jax.experimental import pallas as pl
from jax.experimental.pallas import tpu as pltpu

F_PAD = 128  # lane-dense feature width used for all layers inside the kernel


def _sage3_kernel(a_ref, h_ref,
                  w1s_ref, w1n_ref, b1_ref,
                  w2s_ref, w2n_ref, b2_ref,
                  w3s_ref, w3n_ref, b3_ref,
                  o_ref):
    """Fused 3-layer SAGE forward for ONE subgraph (one grid step).

    a_ref  : (N, N)        bf16 row-normalized adjacency
    h_ref  : (N, F_PAD)    f32 input node features (zero-padded)
    w*_ref : (F_PAD, F_PAD) bf16 padded W_self / W_neigh
    b*_ref : (1, F_PAD)    f32 padded bias
    o_ref  : (N, F_PAD)    f32 output (logits in the first n_classes lanes)
    """
    a = a_ref[...]            # bf16, reused by all 3 layers
    h = h_ref[...]            # f32

    def layer(h, ws, wn, b, relu):
        hb = h.astype(jnp.bfloat16)
        # Two separate 128-wide MXU matmuls (no sub-128 lane slicing).
        p_self = jnp.dot(hb, ws, preferred_element_type=jnp.float32)
        p_neigh = jnp.dot(hb, wn, preferred_element_type=jnp.float32)
        # Reassociated mean aggregation: A @ (H @ W_neigh); bf16 MXU, f32 accum.
        agg = jnp.dot(a, p_neigh.astype(jnp.bfloat16),
                      preferred_element_type=jnp.float32)
        out = p_self + agg + b        # f32 elementwise
        if relu:
            out = jnp.maximum(out, 0.0)
            # TODO(synk): training-mode nn.Dropout(0.5) is stochastic; this is
            # eval-mode identity (matches model.eval() semantics).
        return out

    h = layer(h, w1s_ref[...], w1n_ref[...], b1_ref[...], relu=True)
    h = layer(h, w2s_ref[...], w2n_ref[...], b2_ref[...], relu=True)
    h = layer(h, w3s_ref[...], w3n_ref[...], b3_ref[...], relu=False)
    o_ref[...] = h


def _pad_params(params, in_feats, f_pad=F_PAD):
    """Zero-pad (W_self, W_neigh, bias) per layer to (f_pad, f_pad)/(1, f_pad)."""
    padded = []
    fin = in_feats
    for (w_self, w_neigh, b) in params:
        fo = w_self.shape[1]
        ws = (jnp.zeros((f_pad, f_pad), jnp.float32)
              .at[:fin, :fo].set(w_self).astype(jnp.bfloat16))
        wn = (jnp.zeros((f_pad, f_pad), jnp.float32)
              .at[:fin, :fo].set(w_neigh).astype(jnp.bfloat16))
        bp = jnp.zeros((1, f_pad), jnp.float32).at[0, :fo].set(b.reshape(-1))
        padded.append((ws, wn, bp))
        fin = fo
    return padded


def sage_forward(adj_norm, x, params, *, f_pad=F_PAD):
    """Batched 3-layer SAGE forward (inference).

    adj_norm : (B, N, N) row-normalized adjacency per subgraph
    x        : (B, N, in_feats) node features
    params   : list of (w_self, w_neigh, bias) per layer
    returns  : (B, N, n_classes) logits
    """
    B, N, _ = adj_norm.shape
    in_feats = x.shape[-1]
    n_classes = params[-1][0].shape[1]

    adj_in = adj_norm.astype(jnp.bfloat16)                       # halve A DMA bytes
    x_p = jnp.pad(x.astype(jnp.float32),
                  ((0, 0), (0, 0), (0, f_pad - in_feats)))       # lane-dense input
    padded = _pad_params(params, in_feats, f_pad)

    flat_inputs = [adj_in, x_p]
    for (ws, wn, bp) in padded:
        flat_inputs += [ws, wn, bp]

    graph_specs = [
        pl.BlockSpec((None, N, N), lambda b: (b, 0, 0)),
        pl.BlockSpec((None, N, f_pad), lambda b: (b, 0, 0)),
    ]
    layer_specs = []
    for _ in range(3):
        layer_specs += [
            pl.BlockSpec((f_pad, f_pad), lambda b: (0, 0)),   # W_self  (resident)
            pl.BlockSpec((f_pad, f_pad), lambda b: (0, 0)),   # W_neigh (resident)
            pl.BlockSpec((1, f_pad), lambda b: (0, 0)),       # bias    (resident)
        ]
    in_specs = graph_specs + layer_specs

    # Per-subgraph: 2 projection matmuls + 1 aggregation matmul per layer.
    flops = B * 3 * (2 * 2 * N * f_pad * f_pad + 2 * N * N * f_pad)
    bytes_accessed = (B * N * N * 2                       # A (bf16)
                      + B * N * f_pad * 4                 # X (f32, padded)
                      + 3 * (2 * f_pad * f_pad * 2 + f_pad * 4)   # weights + bias
                      + B * N * f_pad * 4)                # output

    out = pl.pallas_call(
        _sage3_kernel,
        out_shape=jax.ShapeDtypeStruct((B, N, f_pad), jnp.float32),
        grid=(B,),
        in_specs=in_specs,
        out_specs=pl.BlockSpec((None, N, f_pad), lambda b: (b, 0, 0)),
        compiler_params=pltpu.CompilerParams(
            dimension_semantics=("parallel",)),      # shards batch over v7x's 2 TCs
        cost_estimate=pl.CostEstimate(
            flops=flops, transcendentals=0, bytes_accessed=bytes_accessed),
    )(*flat_inputs)

    return out[..., :n_classes]


def _init_linear(key, fan_in, fan_out):
    # Xavier-uniform-ish deterministic init (matches DGL SAGEConv's reset).
    bound = (6.0 / (fan_in + fan_out)) ** 0.5
    return jax.random.uniform(key, (fan_in, fan_out), jnp.float32, -bound, bound)


if __name__ == "__main__":
    key = jax.random.PRNGKey(0)
    k_graph, k_x, *k_w = jax.random.split(key, 2 + 6)

    # Small synthetic problem consistent with the module: B cluster subgraphs.
    B = 4            # subgraphs per batch (grid axis)
    N = 64           # nodes per cluster subgraph
    in_feats = 32
    n_hidden = 32
    n_classes = 16

    # Deterministic random directed graphs -> dense row-normalized adjacency.
    edge_prob = 0.1
    adj = (jax.random.uniform(k_graph, (B, N, N)) < edge_prob).astype(jnp.float32)
    in_deg = jnp.sum(adj, axis=2, keepdims=True)
    adj_norm = adj / jnp.maximum(in_deg, 1.0)   # zero in-degree rows stay zero

    # Node features.
    x = jax.random.normal(k_x, (B, N, in_feats), jnp.float32)

    # Parameters: 3 SAGEConv layers, each with W_self, W_neigh, bias.
    dims = [(in_feats, n_hidden), (n_hidden, n_hidden), (n_hidden, n_classes)]
    params = []
    for li, (fi, fo) in enumerate(dims):
        w_self = _init_linear(k_w[2 * li], fi, fo)
        w_neigh = _init_linear(k_w[2 * li + 1], fi, fo)
        b = jnp.zeros((fo,), jnp.float32)
        params.append((w_self, w_neigh, b))

    out = sage_forward(adj_norm, x, params)
    out = jax.block_until_ready(out)
    assert out.shape == (B, N, n_classes)

    # --- Reference 1: matched precision (same padding, bf16 casts, association).
    padded = _pad_params(params, in_feats, F_PAD)
    adj_bf = adj_norm.astype(jnp.bfloat16)
    h = jnp.pad(x, ((0, 0), (0, 0), (0, F_PAD - in_feats)))
    for l, (ws, wn, bp) in enumerate(padded):
        hb = h.astype(jnp.bfloat16)
        p_self = jnp.einsum('bnf,fo->bno', hb, ws,
                            preferred_element_type=jnp.float32)
        p_neigh = jnp.einsum('bnf,fo->bno', hb, wn,
                             preferred_element_type=jnp.float32)
        agg = jnp.einsum('bnm,bmo->bno', adj_bf, p_neigh.astype(jnp.bfloat16),
                         preferred_element_type=jnp.float32)
        h = p_self + agg + bp
        if l != 2:
            h = jnp.maximum(h, 0.0)
    ref_matched = h[..., :n_classes]
    assert jnp.allclose(out, ref_matched, atol=2e-3, rtol=2e-3)

    # --- Reference 2: plain f32, unpadded, ORIGINAL association (semantic check;
    # loose tolerance absorbs the intentional bf16 MXU-input rounding).
    h = x
    for l, (w_self, w_neigh, b) in enumerate(params):
        h = (jnp.einsum('bnf,fo->bno', h, w_self)
             + jnp.einsum('bnm,bmf,fo->bno', adj_norm, h, w_neigh)
             + b)
        if l != 2:
            h = jnp.maximum(h, 0.0)
    assert jnp.allclose(out, h, atol=1e-1, rtol=1e-1)

    print("KERNEL_OK")
</pallas_src>

<mosaic_0001>
module attributes {stable_mosaic.version = 11 : i64} {
  func.func @_sage3_kernel(%arg0: i32, %arg1: memref<1x64x64xbf16, #tpu.memory_space<vmem>>, %arg2: memref<1x64x128xf32, #tpu.memory_space<vmem>>, %arg3: memref<128x128xbf16, #tpu.memory_space<vmem>>, %arg4: memref<128x128xbf16, #tpu.memory_space<vmem>>, %arg5: memref<1x128xf32, #tpu.memory_space<vmem>>, %arg6: memref<128x128xbf16, #tpu.memory_space<vmem>>, %arg7: memref<128x128xbf16, #tpu.memory_space<vmem>>, %arg8: memref<1x128xf32, #tpu.memory_space<vmem>>, %arg9: memref<128x128xbf16, #tpu.memory_space<vmem>>, %arg10: memref<128x128xbf16, #tpu.memory_space<vmem>>, %arg11: memref<1x128xf32, #tpu.memory_space<vmem>>, %arg12: memref<1x64x128xf32, #tpu.memory_space<vmem>>) attributes {dimension_semantics = [#tpu.dimension_semantics<parallel>], iteration_bounds = array<i64: 4>, scalar_prefetch = 0 : i64, scratch_operands = 0 : i64, tpu.core_type = #tpu.core_type<tc>, window_params = [{transform_indices = @transform_0, window_bounds = array<i64: 1, 64, 64>}, {transform_indices = @transform_1, window_bounds = array<i64: 1, 64, 128>}, {pipeline_mode = #tpu.pipeline_mode<synchronous>, transform_indices = @transform_2, window_bounds = array<i64: 128, 128>}, {pipeline_mode = #tpu.pipeline_mode<synchronous>, transform_indices = @transform_3, window_bounds = array<i64: 128, 128>}, {pipeline_mode = #tpu.pipeline_mode<synchronous>, transform_indices = @transform_4, window_bounds = array<i64: 1, 128>}, {pipeline_mode = #tpu.pipeline_mode<synchronous>, transform_indices = @transform_5, window_bounds = array<i64: 128, 128>}, {pipeline_mode = #tpu.pipeline_mode<synchronous>, transform_indices = @transform_6, window_bounds = array<i64: 128, 128>}, {pipeline_mode = #tpu.pipeline_mode<synchronous>, transform_indices = @transform_7, window_bounds = array<i64: 1, 128>}, {pipeline_mode = #tpu.pipeline_mode<synchronous>, transform_indices = @transform_8, window_bounds = array<i64: 128, 128>}, {pipeline_mode = #tpu.pipeline_mode<synchronous>, transform_indices = @transform_9, window_bounds = array<i64: 128, 128>}, {pipeline_mode = #tpu.pipeline_mode<synchronous>, transform_indices = @transform_10, window_bounds = array<i64: 1, 128>}, {transform_indices = @transform_11, window_bounds = array<i64: 1, 64, 128>}]} {
    %c0 = arith.constant 0 : index
    %c0_0 = arith.constant 0 : index
    %c0_1 = arith.constant 0 : index
    %0 = vector.load %arg1[%c0, %c0_0, %c0_1] : memref<1x64x64xbf16, #tpu.memory_space<vmem>>, vector<1x64x64xbf16>
    %1 = vector.shape_cast %0 : vector<1x64x64xbf16> to vector<64x64xbf16>
    %c0_2 = arith.constant 0 : index
    %c0_3 = arith.constant 0 : index
    %c0_4 = arith.constant 0 : index
    %2 = vector.load %arg2[%c0_2, %c0_3, %c0_4] : memref<1x64x128xf32, #tpu.memory_space<vmem>>, vector<1x64x128xf32>
    %3 = vector.shape_cast %2 : vector<1x64x128xf32> to vector<64x128xf32>
    %c0_5 = arith.constant 0 : index
    %c0_6 = arith.constant 0 : index
    %4 = vector.load %arg3[%c0_5, %c0_6] : memref<128x128xbf16, #tpu.memory_space<vmem>>, vector<128x128xbf16>
    %c0_7 = arith.constant 0 : index
    %c0_8 = arith.constant 0 : index
    %5 = vector.load %arg4[%c0_7, %c0_8] : memref<128x128xbf16, #tpu.memory_space<vmem>>, vector<128x128xbf16>
    %c0_9 = arith.constant 0 : index
    %c0_10 = arith.constant 0 : index
    %6 = vector.load %arg5[%c0_9, %c0_10] : memref<1x128xf32, #tpu.memory_space<vmem>>, vector<1x128xf32>
    %7 = arith.truncf %3 : vector<64x128xf32> to vector<64x128xbf16>
    %cst = arith.constant dense<0.000000e+00> : vector<64x128xf32>
    %8 = tpu.matmul %7, %4, %cst {dimension_numbers = #tpu.dot_dimension_numbers<[1], [0], [0], [1], [0, 0, 1, 1], [], []>} : vector<64x128xbf16>, vector<128x128xbf16>, vector<64x128xf32> -> vector<64x128xf32>
    %cst_11 = arith.constant dense<0.000000e+00> : vector<64x128xf32>
    %9 = tpu.matmul %7, %5, %cst_11 {dimension_numbers = #tpu.dot_dimension_numbers<[1], [0], [0], [1], [0, 0, 1, 1], [], []>} : vector<64x128xbf16>, vector<128x128xbf16>, vector<64x128xf32> -> vector<64x128xf32>
    %10 = arith.truncf %9 : vector<64x128xf32> to vector<64x128xbf16>
    %cst_12 = arith.constant dense<0.000000e+00> : vector<64x128xf32>
    %11 = tpu.matmul %1, %10, %cst_12 {dimension_numbers = #tpu.dot_dimension_numbers<[1], [0], [0], [1], [0, 0, 1, 1], [], []>} : vector<64x64xbf16>, vector<64x128xbf16>, vector<64x128xf32> -> vector<64x128xf32>
    %12 = arith.addf %8, %11 : vector<64x128xf32>
    %13 = vector.broadcast %6 : vector<1x128xf32> to vector<64x128xf32>
    %14 = arith.addf %12, %13 : vector<64x128xf32>
    %cst_13 = arith.constant 0.000000e+00 : f32
    %15 = vector.broadcast %cst_13 : f32 to vector<64x128xf32>
    %16 = arith.maximumf %14, %15 : vector<64x128xf32>
    %c0_14 = arith.constant 0 : index
    %c0_15 = arith.constant 0 : index
    %17 = vector.load %arg6[%c0_14, %c0_15] : memref<128x128xbf16, #tpu.memory_space<vmem>>, vector<128x128xbf16>
    %c0_16 = arith.constant 0 : index
    %c0_17 = arith.constant 0 : index
    %18 = vector.load %arg7[%c0_16, %c0_17] : memref<128x128xbf16, #tpu.memory_space<vmem>>, vector<128x128xbf16>
    %c0_18 = arith.constant 0 : index
    %c0_19 = arith.constant 0 : index
    %19 = vector.load %arg8[%c0_18, %c0_19] : memref<1x128xf32, #tpu.memory_space<vmem>>, vector<1x128xf32>
    %20 = arith.truncf %16 : vector<64x128xf32> to vector<64x128xbf16>
    %cst_20 = arith.constant dense<0.000000e+00> : vector<64x128xf32>
    %21 = tpu.matmul %20, %17, %cst_20 {dimension_numbers = #tpu.dot_dimension_numbers<[1], [0], [0], [1], [0, 0, 1, 1], [], []>} : vector<64x128xbf16>, vector<128x128xbf16>, vector<64x128xf32> -> vector<64x128xf32>
    %cst_21 = arith.constant dense<0.000000e+00> : vector<64x128xf32>
    %22 = tpu.matmul %20, %18, %cst_21 {dimension_numbers = #tpu.dot_dimension_numbers<[1], [0], [0], [1], [0, 0, 1, 1], [], []>} : vector<64x128xbf16>, vector<128x128xbf16>, vector<64x128xf32> -> vector<64x128xf32>
    %23 = arith.truncf %22 : vector<64x128xf32> to vector<64x128xbf16>
    %cst_22 = arith.constant dense<0.000000e+00> : vector<64x128xf32>
    %24 = tpu.matmul %1, %23, %cst_22 {dimension_numbers = #tpu.dot_dimension_numbers<[1], [0], [0], [1], [0, 0, 1, 1], [], []>} : vector<64x64xbf16>, vector<64x128xbf16>, vector<64x128xf32> -> vector<64x128xf32>
    %25 = arith.addf %21, %24 : vector<64x128xf32>
    %26 = vector.broadcast %19 : vector<1x128xf32> to vector<64x128xf32>
    %27 = arith.addf %25, %26 : vector<64x128xf32>
    %cst_23 = arith.constant 0.000000e+00 : f32
    %28 = vector.broadcast %cst_23 : f32 to vector<64x128xf32>
    %29 = arith.maximumf %27, %28 : vector<64x128xf32>
    %c0_24 = arith.constant 0 : index
    %c0_25 = arith.constant 0 : index
    %30 = vector.load %arg9[%c0_24, %c0_25] : memref<128x128xbf16, #tpu.memory_space<vmem>>, vector<128x128xbf16>
    %c0_26 = arith.constant 0 : index
    %c0_27 = arith.constant 0 : index
    %31 = vector.load %arg10[%c0_26, %c0_27] : memref<128x128xbf16, #tpu.memory_space<vmem>>, vector<128x128xbf16>
    %c0_28 = arith.constant 0 : index
    %c0_29 = arith.constant 0 : index
    %32 = vector.load %arg11[%c0_28, %c0_29] : memref<1x128xf32, #tpu.memory_space<vmem>>, vector<1x128xf32>
    %33 = arith.truncf %29 : vector<64x128xf32> to vector<64x128xbf16>
    %cst_30 = arith.constant dense<0.000000e+00> : vector<64x128xf32>
    %34 = tpu.matmul %33, %30, %cst_30 {dimension_numbers = #tpu.dot_dimension_numbers<[1], [0], [0], [1], [0, 0, 1, 1], [], []>} : vector<64x128xbf16>, vector<128x128xbf16>, vector<64x128xf32> -> vector<64x128xf32>
    %cst_31 = arith.constant dense<0.000000e+00> : vector<64x128xf32>
    %35 = tpu.matmul %33, %31, %cst_31 {dimension_numbers = #tpu.dot_dimension_numbers<[1], [0], [0], [1], [0, 0, 1, 1], [], []>} : vector<64x128xbf16>, vector<128x128xbf16>, vector<64x128xf32> -> vector<64x128xf32>
    %36 = arith.truncf %35 : vector<64x128xf32> to vector<64x128xbf16>
    %cst_32 = arith.constant dense<0.000000e+00> : vector<64x128xf32>
    %37 = tpu.matmul %1, %36, %cst_32 {dimension_numbers = #tpu.dot_dimension_numbers<[1], [0], [0], [1], [0, 0, 1, 1], [], []>} : vector<64x64xbf16>, vector<64x128xbf16>, vector<64x128xf32> -> vector<64x128xf32>
    %38 = arith.addf %34, %37 : vector<64x128xf32>
    %39 = vector.broadcast %32 : vector<1x128xf32> to vector<64x128xf32>
    %40 = arith.addf %38, %39 : vector<64x128xf32>
    %c0_33 = arith.constant 0 : index
    %c0_34 = arith.constant 0 : index
    %c0_35 = arith.constant 0 : index
    %41 = vector.load %arg12[%c0_33, %c0_34, %c0_35] : memref<1x64x128xf32, #tpu.memory_space<vmem>>, vector<1x64x128xf32>
    %42 = vector.shape_cast %41 : vector<1x64x128xf32> to vector<64x128xf32>
    %43 = vector.shape_cast %40 : vector<64x128xf32> to vector<1x64x128xf32>
    tpu.vector_store %arg12[%c0_33, %c0_34, %c0_35], %43 {strides = array<i32>} : memref<1x64x128xf32, #tpu.memory_space<vmem>>, vector<1x64x128xf32>,
    return
  }
  func.func @transform_0(%arg0: i32) -> (i32, i32, i32) {
    %c0_i32 = arith.constant 0 : i32
    %c0_i32_0 = arith.constant 0 : i32
    %c0_i32_1 = arith.constant 0 : i32
    return %arg0, %c0_i32, %c0_i32_0 : i32, i32, i32
  }
  func.func @transform_1(%arg0: i32) -> (i32, i32, i32) {
    %c0_i32 = arith.constant 0 : i32
    %c0_i32_0 = arith.constant 0 : i32
    %c0_i32_1 = arith.constant 0 : i32
    return %arg0, %c0_i32, %c0_i32_0 : i32, i32, i32
  }
  func.func @transform_2(%arg0: i32) -> (i32, i32) {
    %c0_i32 = arith.constant 0 : i32
    %c0_i32_0 = arith.constant 0 : i32
    %c0_i32_1 = arith.constant 0 : i32
    return %c0_i32, %c0_i32_0 : i32, i32
  }
  func.func @transform_3(%arg0: i32) -> (i32, i32) {
    %c0_i32 = arith.constant 0 : i32
    %c0_i32_0 = arith.constant 0 : i32
    %c0_i32_1 = arith.constant 0 : i32
    return %c0_i32, %c0_i32_0 : i32, i32
  }
  func.func @transform_4(%arg0: i32) -> (i32, i32) {
    %c0_i32 = arith.constant 0 : i32
    %c0_i32_0 = arith.constant 0 : i32
    %c0_i32_1 = arith.constant 0 : i32
    return %c0_i32, %c0_i32_0 : i32, i32
  }
  func.func @transform_5(%arg0: i32) -> (i32, i32) {
    %c0_i32 = arith.constant 0 : i32
    %c0_i32_0 = arith.constant 0 : i32
    %c0_i32_1 = arith.constant 0 : i32
    return %c0_i32, %c0_i32_0 : i32, i32
  }
  func.func @transform_6(%arg0: i32) -> (i32, i32) {
    %c0_i32 = arith.constant 0 : i32
    %c0_i32_0 = arith.constant 0 : i32
    %c0_i32_1 = arith.constant 0 : i32
    return %c0_i32, %c0_i32_0 : i32, i32
  }
  func.func @transform_7(%arg0: i32) -> (i32, i32) {
    %c0_i32 = arith.constant 0 : i32
    %c0_i32_0 = arith.constant 0 : i32
    %c0_i32_1 = arith.constant 0 : i32
    return %c0_i32, %c0_i32_0 : i32, i32
  }
  func.func @transform_8(%arg0: i32) -> (i32, i32) {
    %c0_i32 = arith.constant 0 : i32
    %c0_i32_0 = arith.constant 0 : i32
    %c0_i32_1 = arith.constant 0 : i32
    return %c0_i32, %c0_i32_0 : i32, i32
  }
  func.func @transform_9(%arg0: i32) -> (i32, i32) {
    %c0_i32 = arith.constant 0 : i32
    %c0_i32_0 = arith.constant 0 : i32
    %c0_i32_1 = arith.constant 0 : i32
    return %c0_i32, %c0_i32_0 : i32, i32
  }
  func.func @transform_10(%arg0: i32) -> (i32, i32) {
    %c0_i32 = arith.constant 0 : i32
    %c0_i32_0 = arith.constant 0 : i32
    %c0_i32_1 = arith.constant 0 : i32
    return %c0_i32, %c0_i32_0 : i32, i32
  }
  func.func @transform_11(%arg0: i32) -> (i32, i32, i32) {
    %c0_i32 = arith.constant 0 : i32
    %c0_i32_0 = arith.constant 0 : i32
    %c0_i32_1 = arith.constant 0 : i32
    return %arg0, %c0_i32, %c0_i32_0 : i32, i32, i32
  }
}

</mosaic_0001>

<bundles_post_ra>
// kernel: tpu_custom_call.1
= control target key start
LH: loop header
LB: loop body
LE: loop exit
PB: predicated region body
PF: predicated region fallthrough
CT: control target
= control target key end

     0   :  { %s2632_s0 = inlined_call_operand.hbm [shape: bf16[4,64,64], index: 0, kind: input, shape index: {}]   ;;  %s2633_s1 = inlined_call_operand.hbm [shape: f32[4,64,128], index: 1, kind: input, shape index: {}]   ;;  %s2634_s2 = inlined_call_operand.hbm [shape: bf16[128,128], index: 2, kind: input, shape index: {}]   ;;  %s2635_s3 = inlined_call_operand.hbm [shape: bf16[128,128], index: 3, kind: input, shape index: {}]   ;;  %s2636_s4 = inlined_call_operand.vmem [shape: f32[1,128], index: 4, kind: input, shape index: {}]   ;;  %s2637_s5 = inlined_call_operand.hbm [shape: bf16[128,128], index: 5, kind: input, shape index: {}]   ;;  %s2638_s6 = inlined_call_operand.hbm [shape: bf16[128,128], index: 6, kind: input, shape index: {}]   ;;  %s2639_s7 = inlined_call_operand.vmem [shape: f32[1,128], index: 7, kind: input, shape index: {}]   ;;  %s2640_s8 = inlined_call_operand.hbm [shape: bf16[128,128], index: 8, kind: input, shape index: {}]   ;;  %s2641_s9 = inlined_call_operand.hbm [shape: bf16[128,128], index: 9, kind: input, shape index: {}]   ;;  %s2642_s10 = inlined_call_operand.vmem [shape: f32[1,128], index: 10, kind: input, shape index: {}]   ;;  %s2643_s11 = inlined_call_operand.hbm [shape: f32[4,64,128], index: 11, kind: output, shape index: {}]  }
   0x1   :  { %2650 = sst [smem:[#allocation28_spill]] %s2634_s2 }
   0x2   :  { %2651 = sst [smem:[#allocation29_spill]] %s2635_s3 }
   0x3   :  { %2652 = sst [smem:[#allocation30_spill]] %s2637_s5 }
   0x4   :  { %2653 = sst [smem:[#allocation31_spill]] %s2638_s6 }
   0x5   :  { %2654 = sst [smem:[#allocation32_spill]] %s2640_s8 }
   0x6   :  { %2655 = sst [smem:[#allocation33_spill]] %s2641_s9 }
   0x7   :  { %16 = vsyncpa [#allocation3], 0 }
   0x8   :  { %18 = vsyncpa [#allocation3 + $0x1], 0 }
   0x9   :  { %19 = vsyncpa [#allocation6], 0 }
   0xa   :  { %21 = vsyncpa [#allocation6 + $0x1], 0 }
   0xb   :  { %22 = vsyncpa [#allocation9], 0 }
   0xc   :  { %23 = vsyncpa [#allocation12], 0 }
   0xd   :  { %24 = vsyncpa [#allocation15], 0 }
   0xe   :  { %25 = vsyncpa [#allocation4], 0 }
   0xf   :  { %27 = vsyncpa [#allocation4 + $0x1], 0  ;;  %s2326_s17 = smov 0   ;;  %s2328_s18 = smov 0  }
  0x10   :  { %s2330_s19 = smov 0   ;;  %s2332_s20 = smov 0  }
  0x11 LB: > { %2656 = sst [smem:[#allocation24_spill]] %s2248_s19  ;;  %s2350_s24 = sadd.s32 4294967295, %s2252_s20   ;;  %s2252_s20 = sphi %s2332_s20, %s2676_s20   ;;  %s2248_s19 = sphi %s2330_s19, %s2678_s19   ;;  %s2244_s18 = sphi %s2328_s18, %s2680_s18   ;;  %s2240_s17 = sphi %s2326_s17, %s2679_s17  }
  0x12   : > { %s2657_s2 = sld [smem:[#allocation28_spill]]  ;;  %p1497_p0 = scmp.ge.s32.totalorder %s2252_s20, 1 }
  0x13   : > { %p54_p1 = scmp.eq.s32.totalorder %s2350_s24, 0  ;;  %p305_p2 = scmp.lt.s32.totalorder %s2252_s20, 5 }
  0x14   : > { %s2254_s26 = smov [#allocation7]   ;;  %s2659_s3 = sld [smem:[#allocation29_spill]] }
  0x15   : > { %p2355_p3 = pnand %p1497_p0, %p305_p2  ;;  %s318_s27 = sshll.u32 %s2254_s26, 4  ;;  %s319_s27 = int_to_ptr.vmem [resolvable:$true] %s318_s27 }
  0x16   : > { %s2661_s6 = sld [smem:[#allocation31_spill]]  ;;  %s2255_s16 = smov [#allocation8]  }
  0x17   : > { %p1835_p4 = pneg %p2355_p3  ;;  %s332_s21 = sshll.u32 %s2255_s16, 4  ;;  %s333_s21 = int_to_ptr.vmem [resolvable:$true] %s332_s21 }
  0x18   : > { %s316_s23 = sshll.u32 %s2657_s2, 4  ;;  %s2644_s22 = smov 64   ;;  %s317_s23 = int_to_ptr.hbm [resolvable:$true] %s316_s23 }
  0x19   : > { %p2366_p5 = pnand %p1835_p4, %p54_p1  ;;  %s2645_s26 = smov 4  }
  0x1a   : > { %s330_s30 = sshll.u32 %s2659_s3, 4  ;;  %s2662_s5 = sld [smem:[#allocation30_spill]]  ;;  %s331_s30 = int_to_ptr.hbm [resolvable:$true] %s330_s30 }
  0x1b   : > { %1838 = dma.hbm_to_vmem [thread:$0]  (!%p2366_p5), %s317_s23, 1024, %s319_s27, [#allocation6], %s2644_s22, %s2644_s22, %s2645_s26  }
  0x1c   : > { %s361_s15 = sshll.u32 %s2661_s6, 4  ;;  %s2258_s14 = smov [#allocation11]   ;;  %s362_s15 = int_to_ptr.hbm [resolvable:$true] %s361_s15 }
  0x1d   : > { %1841 = dma.hbm_to_vmem [thread:$0]  (!%p2366_p5), %s331_s30, 1024, %s333_s21, [#allocation9], %s2644_s22, %s2644_s22, %s2645_s26  }
  0x1e   : > { %s363_s16 = sshll.u32 %s2258_s14, 4  ;;  %s2259_s23 = smov [#allocation10]   ;;  %s364_s16 = int_to_ptr.vmem [resolvable:$true] %s363_s16 }
  0x1f   : > { %1847 = dma.hbm_to_vmem [thread:$0]  (!%p2366_p5), %s362_s15, 1024, %s364_s16, [#allocation12], %s2644_s22, %s2644_s22, %s2645_s26  }
  0x20   : > { %s347_s13 = sshll.u32 %s2662_s5, 4  ;;  %s349_s27 = sshll.u32 %s2259_s23, 4  ;;  %s348_s13 = int_to_ptr.hbm [resolvable:$true] %s347_s13  ;;  %s350_s27 = int_to_ptr.vmem [resolvable:$true] %s349_s27 }
  0x21   : > { %s2663_s8 = sld [smem:[#allocation32_spill]]  ;;  %s2260_s14 = smov [#allocation13]  }
  0x22   : > { %1844 = dma.hbm_to_vmem [thread:$0]  (!%p2366_p5), %s348_s13, 1024, %s350_s27, [#allocation9], %s2644_s22, %s2644_s22, %s2645_s26  }
  0x23   : > { %s2664_s9 = sld [smem:[#allocation33_spill]]  ;;  %s380_s2 = sshll.u32 %s2260_s14, 4  ;;  %s381_s2 = int_to_ptr.vmem [resolvable:$true] %s380_s2 }
  0x24   : > { %s2261_s13 = smov [#allocation14]   ;;  %s1496_s23 = sadd.s32 4294967294, %s2252_s20  }
  0x25   : > { %s394_s16 = sshll.u32 %s2261_s13, 4  ;;  %s2414_s27 = sadd.s32 1, %s2252_s20   ;;  %s395_s16 = int_to_ptr.vmem [resolvable:$true] %s394_s16 }
  0x26   : > { %2665 = sst [smem:[#allocation25_spill]] %s2414_s27  ;;  %s37_s30 = ssub.s32 %s2252_s20, %s2414_s27 }
  0x27   : > { %s378_s21 = sshll.u32 %s2663_s8, 4  ;;  %s40_s28 = sadd.s32 1, %s2248_s19  ;;  %s379_s21 = int_to_ptr.hbm [resolvable:$true] %s378_s21 }
  0x28   : > { %1850 = dma.hbm_to_vmem [thread:$0]  (!%p2366_p5), %s379_s21, 1024, %s381_s2, [#allocation12], %s2644_s22, %s2644_s22, %s2645_s26  }
  0x29   : > { %s392_s29 = sshll.u32 %s2664_s9, 4  ;;  %p38_p6 = scmp.eq.s32.totalorder %s37_s30, 0  ;;  %s393_s29 = int_to_ptr.hbm [resolvable:$true] %s392_s29 }
  0x2a   : > { %1853 = dma.hbm_to_vmem [thread:$0]  (!%p2366_p5), %s393_s29, 1024, %s395_s16, [#allocation15], %s2644_s22, %s2644_s22, %s2645_s26  }
  0x2b   : > { %p47_p7 = scmp.ne.s32.totalorder %s2248_s19, %s2244_s18  ;;  %p48_p8 = scmp.eq.s32.totalorder %s2252_s20, 0 }
  0x2c   : > { %p53_p9 = scmp.ne.s32.totalorder %s2244_s18, %s2240_s17  ;;  %p292_p12 = scmp.eq.s32.totalorder %s2350_s24, 3 }
  0x2d   : > { %s2425_s21 = scalar_select %p38_p6, %s2248_s19, %s40_s28  }
  0x2e   : > { %p2427_p10 = por %p48_p8, %p47_p7  ;;  %p2433_p11 = por %p54_p1, %p53_p9 }
  0x2f   : > { %2666 = sst [smem:[#allocation26_spill]] %s2425_s21  ;;  %p298_p13 = scmp.eq.s32.totalorder %s1496_s23, 3 }
  0x30   : > { %p1871_p0 = scmp.lt.s32.totalorder %s2252_s20, 4  ;;  %s2440_s29 = sand.u32 1, %s2248_s19  }
  0x31   : > { %p2442_p2 = por %p292_p12, %p47_p7  ;;  %p2446_p4 = por %p298_p13, %p53_p9 }
  0x32   : > { %s1505_s13 = sshll.u32 %s2440_s29, 5  ;;  %s1746_s16 = sshll.u32 %s2252_s20, 5 }
  0x33   : > { %s2670_s2 = scalar_select %p2446_p4, 1, 0 }
  0x34   : > { %s420_s23 = scalar_lea.hbm %s2632_s0, %s1746_s16  ;;  %s415_s22 = scalar_lea.vmem [#allocation2], %s1505_s13 }
  0x35   : > { %2671 = sst [smem:[#allocation27_spill]] %s2670_s2  ;;  %s423_s26 = sshll.u32 %s415_s22, 4  ;;  %s424_s26 = int_to_ptr.vmem [resolvable:$true] %s423_s26 }
  0x36   : > { %s421_s3 = sshll.u32 %s420_s23, 4  ;;  %p2457_p5 = pnand %p1871_p0, %p2427_p10  ;;  %s422_s3 = int_to_ptr.hbm [resolvable:$true] %s421_s3 }
  0x37   : > { %s433_s6 = sand.u32 1, %s2252_s20   ;;  %s1508_s8 = sshll.u32 %s2440_s29, 6 }
  0x38   : > { %s412_s9 = scalar_lea.sflag [#allocation3], %s2440_s29  ;;  %s2106_s21 = sshra.s32 %s422_s3, 4  ;;  %s2107_s21 = int_to_ptr.hbm [resolvable:$true] %s2106_s21 }
  0x39   : > { %s2108_s19 = scalar_lea.hbm %s2107_s21, 32  ;;  %p2110_p7 = pneg %p2457_p5 }
  0x3a   : > { %p2109_p6 = scmp.ne.s32.totalorder %s2107_s21, %s2108_s19  ;;  %s2113_s13 = scalar_lea.hbm %s2632_s0, 128 }
  0x3b   : > { %p2114_p10 = scmp.lt.s32.totalorder %s2107_s21, %s2632_s0  ;;  %p2115_p12 = scmp.lt.s32.totalorder %s2113_s13, %s2108_s19 }
  0x3c   : > { %p2111_p8 = pnand %p2110_p7, %p2109_p6 }
  0x3d   : > { %p2116_p13 = por %p2115_p12, %p2114_p10 }
  0x3e   : > { %p2112_p9 = pneg %p2111_p8 }
  0x40   : > { %p2117_p0 = pnand %p2116_p13, %p2112_p9 }
  0x42   : > { %2120 = shalt.err (!%p2117_p0)
}
  0x43   : > { %s2673_s29 = smov 4   ;;  %s2674_s28 = smov 64  }
  0x44   : > { %1857 = dma.hbm_to_vmem [thread:$0]  (!%p2457_p5), %s422_s3, 512, %s424_s26, %s412_s9, %s2674_s28, %s2674_s28, %s2673_s29  }
  0x45   : > { %s1747_s23 = sshll.u32 %s2252_s20, 6  ;;  %s437_s2 = scalar_lea.vmem [#allocation5], %s1508_s8 }
  0x46   : > { %s442_s12 = scalar_lea.hbm %s2633_s1, %s1747_s23  ;;  %s445_s16 = sshll.u32 %s437_s2, 4  ;;  %s446_s16 = int_to_ptr.vmem [resolvable:$true] %s445_s16 }
  0x47   : > { %s443_s21 = sshll.u32 %s442_s12, 4  ;;  %s434_s19 = scalar_lea.sflag [#allocation6], %s433_s6  ;;  %s444_s21 = int_to_ptr.hbm [resolvable:$true] %s443_s21 }
  0x48   : > { %s2136_s13 = sshra.s32 %s444_s21, 4  ;;  %s2143_s26 = scalar_lea.hbm %s2633_s1, 256  ;;  %s2137_s13 = int_to_ptr.hbm [resolvable:$true] %s2136_s13 }
  0x49   : > { %s2138_s30 = scalar_lea.hbm %s2137_s13, 64  ;;  %p2144_p10 = scmp.lt.s32.totalorder %s2137_s13, %s2633_s1 }
  0x4a   : > { %p2139_p6 = scmp.ne.s32.totalorder %s2137_s13, %s2138_s30  ;;  %p2145_p12 = scmp.lt.s32.totalorder %s2143_s26, %s2138_s30 }
  0x4c   : > { %p2141_p8 = pnand %p2139_p6, %p2110_p7  ;;  %p2146_p13 = por %p2145_p12, %p2144_p10 }
  0x4e   : > { %p2142_p9 = pneg %p2141_p8 }
  0x50   : > { %p2147_p0 = pnand %p2146_p13, %p2142_p9 }
  0x52   : > { %2150 = shalt.err (!%p2147_p0)
}
  0x53   : > { %s2262_s6 = smov 128   ;;  %s2263_s8 = smov 8  }
  0x54   : > { %1860 = dma.hbm_to_vmem [thread:$0]  (!%p2457_p5), %s444_s21, 1024, %s446_s16, %s434_s19, %s2262_s6, %s2262_s6, %s2263_s8  }
  0x55   : > { %457 = sbr.rel (%p2355_p3) target bundleno = 1261 (0x4ed), region = 64  ;;  %s2498_s2 = sand.u32 (!%p2355_p3), 1, %s2244_s18  }
  0x56   : > { %s1512_s28 = sshll.u32 (!%p2355_p3), %s2498_s2, 5  ;;  %s460_s23 = scalar_lea.sflag (!%p2355_p3), [#allocation3], %s2498_s2 }
  0x57   : > { %s2502_s22 = scalar_lea.vmem (!%p2355_p3), [#allocation2], %s1512_s28 }
  0x5a   : > { %2211 = dma.done.wait (%p2433_p11), %s460_s23, 512  }
  0x5b   : > { %2213 = vsyncadd (%p2433_p11), %s460_s23, 4294966784  ;;  %s469_s5 = sand.u32 1, %s2350_s24   ;;  %s1513_s25 = sshll.u32 %s2498_s2, 6 }
  0x5c   : > { %s470_s12 = scalar_lea.sflag [#allocation6], %s469_s5  ;;  %s2512_s16 = scalar_lea.vmem [#allocation5], %s1513_s25 }
  0x5d   : > { %2215 = dma.done.wait (%p2433_p11), %s470_s12, 1024  }
  0x5e   : > { %2217 = vsyncadd (%p2433_p11), %s470_s12, 4294966272 }
  0x5f   : > { %2219 = dma.done.wait (%p54_p1), [#allocation6], 1024  }
  0x60   : > { %2221 = vsyncadd (%p54_p1), [#allocation6], 4294966272 }
  0x61   : > { %2223 = dma.done.wait (%p54_p1), [#allocation9], 2048  }
  0x62   : > { %2225 = vsyncadd (%p54_p1), [#allocation9], 4294965248 }
  0x63   : > { %2227 = dma.done.wait (%p54_p1), [#allocation12], 2048  }
  0x64   : > { %2229 = vsyncadd (%p54_p1), [#allocation12], 4294965248 }
  0x65   : > { %2231 = dma.done.wait (%p54_p1), [#allocation15], 1024  }
  0x66   : > { %2233 = vsyncadd (%p54_p1), [#allocation15], 4294966272  ;;  %v1767_v0 = vld [vmem:[#allocation8 + $0x38] sm:$0xff]  ;;  %v1766_v1 = vld [vmem:[#allocation8 + $0x30] sm:$0xff]  ;;  %vm703_vm0 = vcmask 523264   ;;  %s2589_s9 = scalar_lea.vmem [#allocation16], %s1513_s25 }
  0x67   : > { %650 = vmatpush.bf16.msra.mxu0 %v1767_v0  ;;  %v1765_v2 = vld [vmem:[#allocation8 + $0x28] sm:$0xff]  ;;  %v1764_v3 = vld [vmem:[#allocation8 + $0x20] sm:$0xff]  ;;  %v1763_v4 = vld [vmem:[#allocation8 + $0x18] sm:$0xff]  ;;  %s1800_s26 = sshll.u32 %s2350_s24, 6  ;;  %s1340_s8 = sshll.u32 %s2589_s9, 4  ;;  %s1341_s8 = int_to_ptr.vmem [resolvable:$true] %s1340_s8 }
  0x68   : > { %v1762_v5 = vld [vmem:[#allocation8 + $0x10] sm:$0xff]  ;;  %v1761_v6 = vld [vmem:[#allocation8 + $0x8] sm:$0xff]  ;;  %v1760_v7 = vld [vmem:[#allocation8] sm:$0xff]  ;;  %s1339_s6 = scalar_lea.hbm %s2643_s11, %s1800_s26  ;;  %s1328_s23 = scalar_lea.sflag [#allocation4], %s2498_s2 }
  0x69   : > { %v557_v8 = vld [vmem:[%s2512_s16] sm:$0xff]  ;;  %v558_v9 = vld [vmem:[%s2512_s16 + $0x8] sm:$0xff]  ;;  %v559_v11 = vld [vmem:[%s2512_s16 + $0x10] sm:$0xff]  ;;  %s1342_s28 = sshll.u32 %s1339_s6, 4  ;;  %s2186_s12 = scalar_lea.hbm %s2643_s11, 256  ;;  %s1343_s28 = int_to_ptr.hbm [resolvable:$true] %s1342_s28 }
  0x6a   : > { %v598_v10 = vpack.c.bf16 %v558_v9, %v557_v8  ;;  %v560_v12 = vld [vmem:[%s2512_s16 + $0x18] sm:$0xff]  ;;  %v561_v14 = vld [vmem:[%s2512_s16 + $0x20] sm:$0xff]  ;;  %v562_v15 = vld [vmem:[%s2512_s16 + $0x28] sm:$0xff] }
  0x6b   : > { %651 = vmatpush.bf16.msra.mxu0 %v1766_v1  ;;  %v599_v13 = vpack.c.bf16 %v560_v12, %v559_v11  ;;  %v600_v16 = vpack.c.bf16 %v562_v15, %v561_v14  ;;  %v563_v17 = vld [vmem:[%s2512_s16 + $0x30] sm:$0xff]  ;;  %v564_v18 = vld [vmem:[%s2512_s16 + $0x38] sm:$0xff]  ;;  %v2546_v34 = vld [vmem:[%s2502_s22] sm:$0xff] }
  0x6c   : > { %v601_v19 = vpack.c.bf16 %v564_v18, %v563_v17  ;;  %v1759_v31 = vld [vmem:[#allocation7 + $0x38] sm:$0xff]  ;;  %v2543_v33 = vld [vmem:[%s2502_s22 + $0x10] sm:$0xff]  ;;  %v1757_v36 = vld [vmem:[#allocation7 + $0x28] sm:$0xff] }
  0x6d   : > { %v1758_v35 = vld [vmem:[#allocation7 + $0x30] sm:$0xff]  ;;  %v1756_v37 = vld [vmem:[#allocation7 + $0x20] sm:$0xff]  ;;  %v1755_v38 = vld [vmem:[#allocation7 + $0x18] sm:$0xff] }
  0x6e   : > { %v2553_v39 = vld [vmem:[%s2502_s22 + $0x18] sm:$0xff]  ;;  %v2556_v40 = vld [vmem:[%s2502_s22 + $0x8] sm:$0xff]  ;;  %v1754_v41 = vld [vmem:[#allocation7 + $0x10] sm:$0xff]  ;;  %s2180_s22 = sshra.s32 %s1343_s28, 4  ;;  %s2181_s22 = int_to_ptr.hbm [resolvable:$true] %s2180_s22 }
  0x6f   : > { %652 = vmatpush.bf16.msra.mxu0 %v1765_v2  ;;  %v1753_v42 = vld [vmem:[#allocation7 + $0x8] sm:$0xff]  ;;  %v1752_v43 = vld [vmem:[#allocation7] sm:$0xff]  ;;  %v1783_v44 = vld [vmem:[#allocation11 + $0x38] sm:$0xff]  ;;  %s2182_s24 = scalar_lea.hbm %s2181_s22, 64  ;;  %p2187_p5 = scmp.lt.s32.totalorder %s2181_s22, %s2643_s11 }
  0x70   : > { %v1775_v45 = vld [vmem:[#allocation10 + $0x38] sm:$0xff]  ;;  %926 = vmatpush.bf16.msra.mxu3 %v1783_v44  ;;  %v1782_v46 = vld [vmem:[#allocation11 + $0x30] sm:$0xff]  ;;  %v1781_v48 = vld [vmem:[#allocation11 + $0x28] sm:$0xff]  ;;  %p2183_p1 = scmp.ne.s32.totalorder %s2181_s22, %s2182_s24  ;;  %p2188_p7 = scmp.lt.s32.totalorder %s2186_s12, %s2182_s24 }
  0x71   : > { %v1774_v47 = vld [vmem:[#allocation10 + $0x30] sm:$0xff]  ;;  %v1773_v49 = vld [vmem:[#allocation10 + $0x28] sm:$0xff]  ;;  %v1780_v50 = vld [vmem:[#allocation11 + $0x20] sm:$0xff] }
  0x72   : > { %v1772_v51 = vld [vmem:[#allocation10 + $0x20] sm:$0xff]  ;;  %v1779_v53 = vld [vmem:[#allocation11 + $0x18] sm:$0xff]  ;;  %v1778_v55 = vld [vmem:[#allocation11 + $0x10] sm:$0xff]  ;;  %p2184_p3 = pnand %p2183_p1, %p2442_p2  ;;  %p2189_p6 = por %p2188_p7, %p2187_p5 }
  0x73   : > { %653 = vmatpush.bf16.msra.mxu0 %v1764_v3  ;;  %v1771_v54 = vld [vmem:[#allocation10 + $0x18] sm:$0xff]  ;;  %v1770_v56 = vld [vmem:[#allocation10 + $0x10] sm:$0xff]  ;;  %v1777_v58 = vld [vmem:[#allocation11 + $0x8] sm:$0xff] }
  0x74   : > { %927 = vmatpush.bf16.msra.mxu3 %v1782_v46  ;;  %v1769_v59 = vld [vmem:[#allocation10 + $0x8] sm:$0xff]  ;;  %v1776_v60 = vld [vmem:[#allocation11] sm:$0xff]  ;;  %p2185_p11 = pneg %p2184_p3 }
  0x75   : > { %v1768_v61 = vld [vmem:[#allocation10] sm:$0xff] }
  0x76   : > { %p2190_p8 = pnand %p2189_p6, %p2185_p11 }
  0x77   : > { %654 = vmatpush.bf16.msra.mxu0 %v1763_v4  ;;  %v1923_v4 = vld [vmem:[%s2636_s4] ss:$0 sm:$0xff] }
  0x78   : > { %928 = vmatpush.bf16.msra.mxu3 %v1781_v48 }
  0x7b   : > { %655 = vmatpush.bf16.msra.mxu0 %v1762_v5 }
  0x7c   : > { %929 = vmatpush.bf16.msra.mxu3 %v1780_v50 }
  0x7f   : > { %656 = vmatpush.bf16.msra.mxu0 %v1761_v6 }
  0x80   : > { %930 = vmatpush.bf16.msra.mxu3 %v1779_v53 }
  0x83   : > { %657 = vmatpush.bf16.msra.mxu0 %v1760_v7 }
  0x84   : > { %931 = vmatpush.bf16.msra.mxu3 %v1778_v55 }
  0x86   : > { %658 = vmatmul.bf16.vlgmr.msra.gmra.mxu0 %v598_v10 }
  0x87   : > { %1036 = vmatpush.bf16.msrb.mxu0 %v1775_v45 }
  0x88   : > { %932 = vmatpush.bf16.msra.mxu3 %v1777_v58  ;;  %v1791_v58 = vld [vmem:[#allocation13 + $0x38] sm:$0xff] }
  0x8b   : > { %1037 = vmatpush.bf16.msrb.mxu0 %v1774_v47 }
  0x8c   : > { %933 = vmatpush.bf16.msra.mxu3 %v1776_v60  ;;  %v1790_v60 = vld [vmem:[#allocation13 + $0x30] sm:$0xff] }
  0x8f   : > { %1038 = vmatpush.bf16.msrb.mxu0 %v1773_v49 }
  0x93   : > { %1039 = vmatpush.bf16.msrb.mxu0 %v1772_v51 }
  0x96   : > { %663 = vmatmul.bf16.gmra.mxu0 %v599_v13 }
  0x97   : > { %1040 = vmatpush.bf16.msrb.mxu0 %v1771_v54 }
  0x9b   : > { %1041 = vmatpush.bf16.msrb.mxu0 %v1770_v56 }
  0x9f   : > { %1042 = vmatpush.bf16.msrb.mxu0 %v1769_v59  ;;  %v1798_v59 = vld [vmem:[#allocation14 + $0x30] sm:$0xff] }
  0xa3   : > { %1043 = vmatpush.bf16.msrb.mxu0 %v1768_v61  ;;  %v1797_v61 = vld [vmem:[#allocation14 + $0x28] sm:$0xff] }
  0xa6   : > { %668 = vmatmul.bf16.gmra.mxu0 %v600_v16 }
  0xb6   : > { %673 = vmatmul.bf16.gmra.mxu0 %v601_v19 }
 0x103   : > { %v659_v20 = vpop.f32.mrf.mxu0 }
 0x10b   : > { %v661_v21 = vpop.f32.mrf.mxu0 }
 0x10c   : > { %v679_v32 = vpack.c.bf16 %v661_v21, %v659_v20 }
 0x113   : > { %v664_v22 = vpop.f32.mrf.mxu0 }
 0x11b   : > { %v666_v23 = vpop.f32.mrf.mxu0 }
 0x11c   : > { %v680_v30 = vpack.c.bf16 %v666_v23, %v664_v22 }
 0x123   : > { %v669_v24 = vpop.f32.mrf.mxu0 }
 0x12b   : > { %v671_v25 = vpop.f32.mrf.mxu0 }
 0x12c   : > { %v681_v29 = vpack.c.bf16 %v671_v25, %v669_v24 }
 0x133   : > { %v674_v26 = vpop.f32.mrf.mxu0 }
 0x13b   : > { %v676_v27 = vpop.f32.mrf.mxu0 }
 0x13c   : > { %v682_v28 = vpack.c.bf16 %v676_v27, %v674_v26 }
 0x13e   : > { %720 = vmatpush.bf16.msra.mxu1 %v682_v28  ;;  %1801 = vmatpush.bf16.msra.mxu2 %v682_v28 }
 0x142   : > { %721 = vmatpush.bf16.msra.mxu1 %v681_v29  ;;  %1802 = vmatpush.bf16.msra.mxu2 %v681_v29 }
 0x146   : > { %722 = vmatpush.bf16.msra.mxu1 %v680_v30  ;;  %1803 = vmatpush.bf16.msra.mxu2 %v680_v30 }
 0x14a   : > { %723 = vmatpush.bf16.msra.mxu1 %v679_v32  ;;  %1804 = vmatpush.bf16.msra.mxu2 %v679_v32 }
 0x14d   : > { %1571 = vmatmul.msk.bf16.vlgmr.msra.gmra.mxu2 %vm703_vm0, %v2543_v33  ;;  %1569 = vmatmul.msk.bf16.vlgmr.msra.gmra.mxu1 %vm703_vm0, %v2546_v34 }
 0x14e   : > { %793 = vmatpush.bf16.msrb.mxu2 %v1759_v31 }
 0x152   : > { %794 = vmatpush.bf16.msrb.mxu2 %v1758_v35 }
 0x156   : > { %795 = vmatpush.bf16.msrb.mxu2 %v1757_v36 }
 0x15a   : > { %796 = vmatpush.bf16.msrb.mxu2 %v1756_v37 }
 0x15d   : > { %1572 = vmatmul.msk.bf16.gmra.mxu2 %vm703_vm0, %v2553_v39  ;;  %1570 = vmatmul.msk.bf16.gmra.mxu1 %vm703_vm0, %v2556_v40 }
 0x15e   : > { %797 = vmatpush.bf16.msrb.mxu2 %v1755_v38 }
 0x162   : > { %798 = vmatpush.bf16.msrb.mxu2 %v1754_v41 }
 0x166   : > { %799 = vmatpush.bf16.msrb.mxu2 %v1753_v42 }
 0x16a   : > { %800 = vmatpush.bf16.msrb.mxu2 %v1752_v43 }
 0x16d   : > { %801 = vmatmul.bf16.vlgmr.msrb.gmra.mxu2 %v598_v10 }
 0x17d   : > { %806 = vmatmul.bf16.gmra.mxu2 %v599_v13 }
 0x18d   : > { %811 = vmatmul.bf16.gmra.mxu2 %v600_v16 }
 0x19d   : > { %816 = vmatmul.bf16.gmra.mxu2 %v601_v19 }
 0x1ca   : > { %v725_v0 = vpop.f32.mrf.mxu1 }
 0x1d0   : > { %v735_v52 = vpop.f32.mrf.mxu2 }
 0x1d2   : > { %v727_v2 = vpop.f32.mrf.mxu1 }
 0x1d8   : > { %v737_v57 = vpop.f32.mrf.mxu2 }
 0x1da   : > { %v730_v11 = vpop.f32.mrf.mxu1 }
 0x1e0   : > { %v740_v62 = vpop.f32.mrf.mxu2 }
 0x1e2   : > { %v732_v15 = vpop.f32.mrf.mxu1 }
 0x1e8   : > { %v742_v63 = vpop.f32.mrf.mxu2 }
 0x1f0   : > { %v802_v1 = vpop.f32.mrf.mxu2 }
 0x1f1   : > { %v803_v3 = vadd.f32 %v802_v1, %v725_v0  ;;  %v1788_v0 = vld [vmem:[#allocation13 + $0x20] sm:$0xff]  ;;  %v1795_v1 = vld [vmem:[#allocation14 + $0x18] sm:$0xff] }
 0x1f3   : > { %v825_v6 = vadd.f32 %v1923_v4, %v803_v3  ;;  %v1794_v3 = vld [vmem:[#allocation14 + $0x10] sm:$0xff] }
 0x1f5   : > { %v833_v9 = vmax.f32 %v825_v6, 0.0  ;;  %v1785_v6 = vld [vmem:[#allocation13 + $0x8] sm:$0xff] }
 0x1f8   : > { %v804_v5 = vpop.f32.mrf.mxu2 }
 0x1f9   : > { %v805_v7 = vadd.f32 %v804_v5, %v727_v2  ;;  %v1787_v2 = vld [vmem:[#allocation13 + $0x18] sm:$0xff]  ;;  %v1793_v5 = vld [vmem:[#allocation14 + $0x8] sm:$0xff] }
 0x1fb   : > { %v826_v8 = vadd.f32 %v1923_v4, %v805_v7  ;;  %v1792_v7 = vld [vmem:[#allocation14] sm:$0xff] }
 0x1fd   : > { %v834_v10 = vmax.f32 %v826_v8, 0.0  ;;  %v1784_v8 = vld [vmem:[#allocation13] sm:$0xff] }
 0x1ff   : > { %v874_v12 = vpack.c.bf16 %v834_v10, %v833_v9 }
 0x200   : > { %v807_v13 = vpop.f32.mrf.mxu2 }
 0x201   : > { %934 = vmatmul.bf16.vlgmr.msra.gmra.mxu3 %v874_v12  ;;  %1044 = vmatmul.bf16.vlgmr.msrb.gmra.mxu0 %v874_v12  ;;  %v808_v14 = vadd.f32 %v807_v13, %v730_v11  ;;  %v1924_v13 = vld [vmem:[%s2639_s7] ss:$0 sm:$0xff] }
 0x203   : > { %v827_v17 = vadd.f32 %v1923_v4, %v808_v14 }
 0x205   : > { %v835_v20 = vmax.f32 %v827_v17, 0.0 }
 0x208   : > { %v809_v16 = vpop.f32.mrf.mxu2 }
 0x209   : > { %v810_v18 = vadd.f32 %v809_v16, %v732_v15 }
 0x20b   : > { %v828_v19 = vadd.f32 %v1923_v4, %v810_v18 }
 0x20d   : > { %v836_v21 = vmax.f32 %v828_v19, 0.0 }
 0x20f   : > { %v875_v22 = vpack.c.bf16 %v836_v21, %v835_v20 }
 0x210   : > { %v812_v23 = vpop.f32.mrf.mxu2 }
 0x211   : > { %939 = vmatmul.bf16.gmra.mxu3 %v875_v22  ;;  %1049 = vmatmul.bf16.gmra.mxu0 %v875_v22  ;;  %v813_v24 = vadd.f32 %v812_v23, %v735_v52 }
 0x213   : > { %v829_v26 = vadd.f32 %v1923_v4, %v813_v24 }
 0x215   : > { %v837_v29 = vmax.f32 %v829_v26, 0.0 }
 0x218   : > { %v814_v25 = vpop.f32.mrf.mxu2 }
 0x219   : > { %v815_v27 = vadd.f32 %v814_v25, %v737_v57  ;;  %v1799_v57 = vld [vmem:[#allocation14 + $0x38] sm:$0xff] }
 0x21a   : > { %1169 = vmatpush.bf16.msra.mxu2 %v1799_v57 }
 0x21b   : > { %v830_v28 = vadd.f32 %v1923_v4, %v815_v27 }
 0x21d   : > { %v838_v30 = vmax.f32 %v830_v28, 0.0 }
 0x21e   : > { %1170 = vmatpush.bf16.msra.mxu2 %v1798_v59 }
 0x21f   : > { %v876_v31 = vpack.c.bf16 %v838_v30, %v837_v29 }
 0x220   : > { %v817_v32 = vpop.f32.mrf.mxu2 }
 0x221   : > { %944 = vmatmul.bf16.gmra.mxu3 %v876_v31  ;;  %1054 = vmatmul.bf16.gmra.mxu0 %v876_v31  ;;  %v818_v35 = vadd.f32 %v817_v32, %v740_v62  ;;  %v1789_v62 = vld [vmem:[#allocation13 + $0x28] sm:$0xff] }
 0x222   : > { %1171 = vmatpush.bf16.msra.mxu2 %v1797_v61 }
 0x223   : > { %v831_v37 = vadd.f32 %v1923_v4, %v818_v35 }
 0x225   : > { %v839_v42 = vmax.f32 %v831_v37, 0.0 }
 0x228   : > { %v819_v36 = vpop.f32.mrf.mxu2 }
 0x229   : > { %v820_v38 = vadd.f32 %v819_v36, %v742_v63  ;;  %v1796_v63 = vld [vmem:[#allocation14 + $0x20] sm:$0xff] }
 0x22a   : > { %1172 = vmatpush.bf16.msra.mxu2 %v1796_v63 }
 0x22b   : > { %v832_v41 = vadd.f32 %v1923_v4, %v820_v38  ;;  %v1786_v4 = vld [vmem:[#allocation13 + $0x10] sm:$0xff] }
 0x22d   : > { %v840_v43 = vmax.f32 %v832_v41, 0.0 }
 0x22e   : > { %1173 = vmatpush.bf16.msra.mxu2 %v1795_v1 }
 0x22f   : > { %v877_v44 = vpack.c.bf16 %v840_v43, %v839_v42 }
 0x231   : > { %949 = vmatmul.bf16.gmra.mxu3 %v877_v44  ;;  %1059 = vmatmul.bf16.gmra.mxu0 %v877_v44 }
 0x232   : > { %1174 = vmatpush.bf16.msra.mxu2 %v1794_v3 }
 0x236   : > { %1175 = vmatpush.bf16.msra.mxu2 %v1793_v5 }
 0x23a   : > { %1176 = vmatpush.bf16.msra.mxu2 %v1792_v7 }
 0x27e   : > { %v1045_v9 = vpop.f32.mrf.mxu0 }
 0x284   : > { %v935_v45 = vpop.f32.mrf.mxu3 }
 0x286   : > { %v1047_v10 = vpop.f32.mrf.mxu0 }
 0x28c   : > { %v937_v46 = vpop.f32.mrf.mxu3 }
 0x28d   : > { %v955_v56 = vpack.c.bf16 %v937_v46, %v935_v45 }
 0x28e   : > { %v1050_v14 = vpop.f32.mrf.mxu0 }
 0x294   : > { %v940_v47 = vpop.f32.mrf.mxu3 }
 0x296   : > { %v1052_v22 = vpop.f32.mrf.mxu0 }
 0x29c   : > { %v942_v48 = vpop.f32.mrf.mxu3 }
 0x29d   : > { %v956_v55 = vpack.c.bf16 %v942_v48, %v940_v47 }
 0x29e   : > { %v1055_v28 = vpop.f32.mrf.mxu0 }
 0x2a4   : > { %v945_v49 = vpop.f32.mrf.mxu3 }
 0x2a6   : > { %v1057_v36 = vpop.f32.mrf.mxu0 }
 0x2ac   : > { %v947_v50 = vpop.f32.mrf.mxu3 }
 0x2ad   : > { %v957_v54 = vpack.c.bf16 %v947_v50, %v945_v49 }
 0x2ae   : > { %v1060_v46 = vpop.f32.mrf.mxu0 }
 0x2b4   : > { %v950_v51 = vpop.f32.mrf.mxu3 }
 0x2b6   : > { %v1062_v50 = vpop.f32.mrf.mxu0 }
 0x2bc   : > { %v952_v52 = vpop.f32.mrf.mxu3 }
 0x2bd   : > { %v958_v53 = vpack.c.bf16 %v952_v52, %v950_v51 }
 0x2bf   : > { %963 = vmatpush.bf16.msrb.mxu1 %v958_v53 }
 0x2c3   : > { %964 = vmatpush.bf16.msrb.mxu1 %v957_v54 }
 0x2c7   : > { %965 = vmatpush.bf16.msrb.mxu1 %v956_v55 }
 0x2cb   : > { %966 = vmatpush.bf16.msrb.mxu1 %v955_v56 }
 0x2ce   : > { %1637 = vmatmul.msk.bf16.vlgmr.msrb.gmra.mxu1 %vm703_vm0, %v2546_v34 }
 0x2cf   : > { %1279 = vmatpush.bf16.msra.mxu1 %v1791_v58 }
 0x2d3   : > { %1280 = vmatpush.bf16.msra.mxu1 %v1790_v60 }
 0x2d7   : > { %1281 = vmatpush.bf16.msra.mxu1 %v1789_v62 }
 0x2db   : > { %1282 = vmatpush.bf16.msra.mxu1 %v1788_v0 }
 0x2de   : > { %1638 = vmatmul.msk.bf16.gmra.mxu1 %vm703_vm0, %v2556_v40 }
 0x2df   : > { %1283 = vmatpush.bf16.msra.mxu1 %v1787_v2 }
 0x2e3   : > { %1284 = vmatpush.bf16.msra.mxu1 %v1786_v4 }
 0x2e7   : > { %1285 = vmatpush.bf16.msra.mxu1 %v1785_v6 }
 0x2eb   : > { %1286 = vmatpush.bf16.msra.mxu1 %v1784_v8  ;;  %v1925_v8 = vld [vmem:[%s2642_s10] ss:$0 sm:$0xff] }
 0x2ee   : > { %1639 = vmatmul.msk.bf16.gmra.mxu1 %vm703_vm0, %v2543_v33 }
 0x2fe   : > { %1640 = vmatmul.msk.bf16.gmra.mxu1 %vm703_vm0, %v2553_v39 }
 0x34b   : > { %v968_v11 = vpop.f32.mrf.mxu1 }
 0x34c   : > { %v1046_v12 = vadd.f32 %v1045_v9, %v968_v11 }
 0x34e   : > { %v1068_v16 = vadd.f32 %v1924_v13, %v1046_v12 }
 0x350   : > { %v1076_v19 = vmax.f32 %v1068_v16, 0.0 }
 0x353   : > { %v970_v15 = vpop.f32.mrf.mxu1 }
 0x354   : > { %v1048_v17 = vadd.f32 %v1047_v10, %v970_v15 }
 0x356   : > { %v1069_v18 = vadd.f32 %v1924_v13, %v1048_v17 }
 0x358   : > { %v1077_v20 = vmax.f32 %v1069_v18, 0.0 }
 0x35a   : > { %v1117_v21 = vpack.c.bf16 %v1077_v20, %v1076_v19 }
 0x35b   : > { %v973_v23 = vpop.f32.mrf.mxu1 }
 0x35c   : > { %1177 = vmatmul.bf16.vlgmr.msra.gmra.mxu2 %v1117_v21  ;;  %1287 = vmatmul.bf16.vlgmr.msra.gmra.mxu1 %v1117_v21  ;;  %v1051_v24 = vadd.f32 %v1050_v14, %v973_v23 }
 0x35e   : > { %v1070_v26 = vadd.f32 %v1924_v13, %v1051_v24 }
 0x360   : > { %v1078_v30 = vmax.f32 %v1070_v26, 0.0 }
 0x363   : > { %v975_v25 = vpop.f32.mrf.mxu1 }
 0x364   : > { %v1053_v27 = vadd.f32 %v1052_v22, %v975_v25 }
 0x366   : > { %v1071_v29 = vadd.f32 %v1924_v13, %v1053_v27 }
 0x368   : > { %v1079_v31 = vmax.f32 %v1071_v29, 0.0 }
 0x36a   : > { %v1118_v32 = vpack.c.bf16 %v1079_v31, %v1078_v30 }
 0x36b   : > { %v978_v35 = vpop.f32.mrf.mxu1 }
 0x36c   : > { %1182 = vmatmul.bf16.gmra.mxu2 %v1118_v32  ;;  %1292 = vmatmul.bf16.gmra.mxu1 %v1118_v32  ;;  %v1056_v37 = vadd.f32 %v1055_v28, %v978_v35 }
 0x36e   : > { %v1072_v41 = vadd.f32 %v1924_v13, %v1056_v37 }
 0x370   : > { %v1080_v44 = vmax.f32 %v1072_v41, 0.0 }
 0x373   : > { %v980_v38 = vpop.f32.mrf.mxu1 }
 0x374   : > { %v1058_v42 = vadd.f32 %v1057_v36, %v980_v38 }
 0x376   : > { %v1073_v43 = vadd.f32 %v1924_v13, %v1058_v42 }
 0x378   : > { %v1081_v45 = vmax.f32 %v1073_v43, 0.0 }
 0x37a   : > { %v1119_v47 = vpack.c.bf16 %v1081_v45, %v1080_v44 }
 0x37b   : > { %v983_v48 = vpop.f32.mrf.mxu1 }
 0x37c   : > { %1187 = vmatmul.bf16.gmra.mxu2 %v1119_v47  ;;  %1297 = vmatmul.bf16.gmra.mxu1 %v1119_v47  ;;  %v1061_v49 = vadd.f32 %v1060_v46, %v983_v48 }
 0x37e   : > { %v1074_v52 = vadd.f32 %v1924_v13, %v1061_v49 }
 0x380   : > { %v1082_v55 = vmax.f32 %v1074_v52, 0.0 }
 0x383   : > { %v985_v51 = vpop.f32.mrf.mxu1 }
 0x384   : > { %v1063_v53 = vadd.f32 %v1062_v50, %v985_v51 }
 0x386   : > { %v1075_v54 = vadd.f32 %v1924_v13, %v1063_v53 }
 0x388   : > { %v1083_v56 = vmax.f32 %v1075_v54, 0.0 }
 0x38a   : > { %v1120_v57 = vpack.c.bf16 %v1083_v56, %v1082_v55 }
 0x38c   : > { %1192 = vmatmul.bf16.gmra.mxu2 %v1120_v57  ;;  %1302 = vmatmul.bf16.gmra.mxu1 %v1120_v57 }
 0x3d9   : > { %v1288_v6 = vpop.f32.mrf.mxu1 }
 0x3df   : > { %v1178_v58 = vpop.f32.mrf.mxu2 }
 0x3e1   : > { %v1290_v7 = vpop.f32.mrf.mxu1 }
 0x3e7   : > { %v1180_v59 = vpop.f32.mrf.mxu2 }
 0x3e8   : > { %v1198_v5 = vpack.c.bf16 %v1180_v59, %v1178_v58 }
 0x3ef   : > { %v1183_v60 = vpop.f32.mrf.mxu2 }
 0x3f7   : > { %v1185_v61 = vpop.f32.mrf.mxu2 }
 0x3f8   : > { %v1199_v4 = vpack.c.bf16 %v1185_v61, %v1183_v60 }
 0x3ff   : > { %v1188_v62 = vpop.f32.mrf.mxu2 }
 0x407   : > { %v1190_v63 = vpop.f32.mrf.mxu2 }
 0x408   : > { %v1200_v3 = vpack.c.bf16 %v1190_v63, %v1188_v62 }
 0x40f   : > { %v1193_v0 = vpop.f32.mrf.mxu2 }
 0x417   : > { %v1195_v1 = vpop.f32.mrf.mxu2 }
 0x418   : > { %v1201_v2 = vpack.c.bf16 %v1195_v1, %v1193_v0 }
 0x41a   : > { %1206 = vmatpush.bf16.msrb.mxu3 %v1201_v2 }
 0x41e   : > { %1207 = vmatpush.bf16.msrb.mxu3 %v1200_v3 }
 0x422   : > { %1208 = vmatpush.bf16.msrb.mxu3 %v1199_v4 }
 0x426   : > { %1209 = vmatpush.bf16.msrb.mxu3 %v1198_v5 }
 0x429   : > { %1705 = vmatmul.msk.bf16.vlgmr.msrb.gmra.mxu3 %vm703_vm0, %v2546_v34 }
 0x439   : > { %1706 = vmatmul.msk.bf16.gmra.mxu3 %vm703_vm0, %v2556_v40 }
 0x449   : > { %1707 = vmatmul.msk.bf16.gmra.mxu3 %vm703_vm0, %v2543_v33  ;;  %v1293_v33 = vpop.f32.mrf.mxu1 }
 0x451   : > { %v1295_v12 = vpop.f32.mrf.mxu1 }
 0x459   : > { %1708 = vmatmul.msk.bf16.gmra.mxu3 %vm703_vm0, %v2553_v39  ;;  %v1298_v18 = vpop.f32.mrf.mxu1 }
 0x461   : > { %v1300_v23 = vpop.f32.mrf.mxu1 }
 0x469   : > { %v1303_v27 = vpop.f32.mrf.mxu1 }
 0x471   : > { %v1305_v31 = vpop.f32.mrf.mxu1 }
 0x4ac   : > { %v1211_v9 = vpop.f32.mrf.mxu3 }
 0x4ad   : > { %v1289_v10 = vadd.f32 %v1288_v6, %v1211_v9 }
 0x4af   : > { %v1311_v11 = vadd.f32 %v1925_v8, %v1289_v10 }
 0x4b1   : > { %1319 = vst [vmem:[%s2589_s9] sm:$0xff] %v1311_v11 }
 0x4b4   : > { %v1213_v34 = vpop.f32.mrf.mxu3 }
 0x4b5   : > { %v1291_v39 = vadd.f32 %v1290_v7, %v1213_v34 }
 0x4b7   : > { %v1312_v40 = vadd.f32 %v1925_v8, %v1291_v39 }
 0x4b9   : > { %1320 = vst [vmem:[%s2589_s9 + $0x8] sm:$0xff] %v1312_v40 }
 0x4bc   : > { %v1216_v13 = vpop.f32.mrf.mxu3 }
 0x4bd   : > { %v1294_v14 = vadd.f32 %v1293_v33, %v1216_v13 }
 0x4bf   : > { %v1313_v15 = vadd.f32 %v1925_v8, %v1294_v14 }
 0x4c1   : > { %1321 = vst [vmem:[%s2589_s9 + $0x10] sm:$0xff] %v1313_v15 }
 0x4c4   : > { %v1218_v16 = vpop.f32.mrf.mxu3 }
 0x4c5   : > { %v1296_v17 = vadd.f32 %v1295_v12, %v1218_v16 }
 0x4c7   : > { %v1314_v19 = vadd.f32 %v1925_v8, %v1296_v17 }
 0x4c9   : > { %1322 = vst [vmem:[%s2589_s9 + $0x18] sm:$0xff] %v1314_v19 }
 0x4cc   : > { %v1221_v20 = vpop.f32.mrf.mxu3 }
 0x4cd   : > { %v1299_v21 = vadd.f32 %v1298_v18, %v1221_v20 }
 0x4cf   : > { %v1315_v22 = vadd.f32 %v1925_v8, %v1299_v21 }
 0x4d1   : > { %1323 = vst [vmem:[%s2589_s9 + $0x20] sm:$0xff] %v1315_v22 }
 0x4d4   : > { %v1223_v24 = vpop.f32.mrf.mxu3 }
 0x4d5   : > { %v1301_v25 = vadd.f32 %v1300_v23, %v1223_v24 }
 0x4d7   : > { %v1316_v26 = vadd.f32 %v1925_v8, %v1301_v25 }
 0x4d9   : > { %1324 = vst [vmem:[%s2589_s9 + $0x28] sm:$0xff] %v1316_v26 }
 0x4dc   : > { %v1226_v28 = vpop.f32.mrf.mxu3 }
 0x4dd   : > { %v1304_v29 = vadd.f32 %v1303_v27, %v1226_v28 }
 0x4df   : > { %v1317_v30 = vadd.f32 %v1925_v8, %v1304_v29 }
 0x4e1   : > { %1325 = vst [vmem:[%s2589_s9 + $0x30] sm:$0xff] %v1317_v30 }
 0x4e4   : > { %v1228_v32 = vpop.f32.mrf.mxu3 }
 0x4e5   : > { %v1306_v35 = vadd.f32 %v1305_v31, %v1228_v32 }
 0x4e7   : > { %v1318_v36 = vadd.f32 %v1925_v8, %v1306_v35 }
 0x4e9   : > { %1326 = vst [vmem:[%s2589_s9 + $0x38] sm:$0xff] %v1318_v36 }
 0x4ea   : > { %2193 = shalt.err (!%p2190_p8)
}
 0x4eb   : > { %s2264_s2 = smov 128   ;;  %s2265_s21 = smov 8  }
 0x4ec   : > { %1833 = dma.vmem_to_hbm [thread:$0]  (%p2442_p2), %s1341_s8, 1024, %s1343_s28, %s1328_s23, %s2264_s2, %s2264_s2, %s2265_s21  }
 0x4ed PF: > { %p1878_p9 = scmp.ge.s32.totalorder %s2252_s20, 2  ;;  %s1357_s13 = sand.u32 1, %s2240_s17  }
 0x4ee   : > { %s1358_s30 = scalar_lea.sflag [#allocation4], %s1357_s13 }
 0x4ef   : > { %p1862_p10 = pnand %p1878_p9, %p2446_p4 }
 0x4f1   : > { %p1863_p12 = pneg %p1862_p10 }
 0x4f3   : > { %2235 = dma.done.wait (%p1863_p12), %s1358_s30, 1024  }
 0x4f4   : > { %2237 = vsyncadd (%p1863_p12), %s1358_s30, 4294966272  ;;  %s2676_s20 = sld [smem:[#allocation25_spill]]  ;;  %s2679_s17 = smov %s2244_s18 }
 0x4f5   : > { %s2677_s3 = sld [smem:[#allocation24_spill]] }
 0x4f6   : > { %s2678_s19 = sld [smem:[#allocation26_spill]] }
 0x4fa   : > { %p30_p13 = scmp.ge.s32.totalorder %s2676_s20, 6  }
 0x4fb   : > { %s2680_s18 = smov %s2677_s3 }
 0x4fc   :  { %32 = sbr.rel (!%p30_p13) target bundleno = 17 (0x11), region = 146 }
 0x501   :  { %1364 = vsyncpa [#allocation3], 1 }
 0x502   :  { %1366 = vsyncpa [#allocation3 + $0x1], 1 }
 0x503   :  { %1367 = vsyncpa [#allocation6], 1 }
 0x504   :  { %1369 = vsyncpa [#allocation6 + $0x1], 1 }
 0x505   :  { %1370 = vsyncpa [#allocation9], 1 }
 0x506   :  { %1371 = vsyncpa [#allocation12], 1 }
 0x507   :  { %1372 = vsyncpa [#allocation15], 1 }
 0x508   :  { %1373 = vsyncpa [#allocation4], 1 }
 0x509   :  { %1375 = vsyncpa [#allocation4 + $0x1], 1 }

</bundles_post_ra>
